<compile_context>
chip_gen: v6e
topology: v6e:2x2x1
jax: 0.10.0
libtpu: 0.0.40
codegen_flags: <defaults>
</compile_context>

<pallas_src>
import functools

import jax
import jax.numpy as jnp
from jax.experimental import pallas as pl
from jax.experimental.pallas import tpu as pltpu


def _round_up(x, n):
    return ((x + n - 1) // n) * n


# ---------------------------------------------------------------------------
# Kernels
# ---------------------------------------------------------------------------

def _ffn_resident_kernel(x_ref, w1_ref, b1_ref, w2_ref, b2_ref, o_ref):
    """Weights fully VMEM-resident.  Grid: (num_row_tiles,)."""
    # x_ref: (tm, d_model); w1_ref: (d_model, hidden); b1_ref: (1, hidden)
    # w2_ref: (hidden, d_model); b2_ref: (1, d_model); o_ref: (tm, d_model)
    h = jnp.dot(x_ref[...], w1_ref[...], preferred_element_type=jnp.float32)
    h = jnp.maximum(h + b1_ref[...].astype(jnp.float32), 0.0)
    # dropout: identity (eval mode).
    acc = jnp.dot(h.astype(w2_ref.dtype), w2_ref[...],
                  preferred_element_type=jnp.float32)
    o_ref[...] = (acc + b2_ref[...].astype(jnp.float32)).astype(o_ref.dtype)


def _ffn_stream_kernel(x_ref, w1_ref, b1_ref, w2_ref, b2_ref, o_ref, acc_ref):
    """Hidden dimension streamed in chunks.  Grid: (num_row_tiles, num_k)."""
    # x_ref:  (tm, d_model)
    # w1_ref: (d_model, tk),  b1_ref: (1, tk)
    # w2_ref: (tk, d_model),  b2_ref: (1, d_model)
    # acc_ref: (tm, d_model) f32 scratch accumulator
    k = pl.program_id(1)

    @pl.when(k == 0)
    def _():
        # Fold the second bias into the accumulator init (single broadcast).
        acc_ref[...] = jnp.broadcast_to(
            b2_ref[...].astype(jnp.float32), acc_ref.shape)

    h = jnp.dot(x_ref[...], w1_ref[...], preferred_element_type=jnp.float32)
    h = jnp.maximum(h + b1_ref[...].astype(jnp.float32), 0.0)
    # dropout: identity (eval mode).
    acc_ref[...] += jnp.dot(h.astype(w2_ref.dtype), w2_ref[...],
                            preferred_element_type=jnp.float32)

    @pl.when(k == pl.num_programs(1) - 1)
    def _():
        o_ref[...] = acc_ref[...].astype(o_ref.dtype)


# ---------------------------------------------------------------------------
# Trace-time planning (pure Python on static shapes)
# ---------------------------------------------------------------------------

_TM_CANDIDATES = (2048, 1024, 768, 512, 384, 256, 128, 64, 32, 16, 8)


def _vmem_budget_bytes():
    """~0.75 of physical VMEM; conservative 48 MiB fallback (safe on v7x)."""
    cap = None
    try:
        info = pltpu.get_tpu_info()
        for name in ("vmem_capacity_bytes", "vmem_size_bytes", "vmem_bytes"):
            cap = getattr(info, name, None)
            if cap:
                break
    except Exception:
        cap = None
    if not cap:
        cap = 64 << 20          # v7x per-TC VMEM; conservative everywhere
    return int(cap) * 3 // 4


def _plan(m, d_model, hidden, x_it, w_it, o_it, budget,
          block_m, block_k, force_stream):
    """Return ("resident", tm, None) or ("stream", tm, tk)."""
    tm_cap = _round_up(m, 8)
    if block_m is not None:
        tm_cands = [min(_round_up(max(block_m, 8), 8), tm_cap)]
    else:
        tm_cands = sorted({min(c, tm_cap) for c in _TM_CANDIDATES},
                          reverse=True)

    w_bytes = (d_model * hidden + hidden * d_model) * w_it   # W1 + W2

    # ---- weights-fully-resident fast path -------------------------------
    if (not force_stream) and 2 * w_bytes <= (budget * 11) // 20:
        def resident_bytes(tm):
            return (2 * w_bytes                      # weights (assume 2 bufs)
                    + 2 * tm * d_model * x_it        # x tile (double-buffered)
                    + 2 * tm * d_model * o_it        # out tile (double-buffered)
                    + tm * hidden * 4                # h intermediate (f32)
                    + tm * hidden * w_it             # h cast for 2nd matmul
                    + tm * d_model * 4)              # acc before final cast
        for tm in tm_cands:
            if resident_bytes(tm) <= budget:
                return ("resident", tm, None)

    # ---- streaming path --------------------------------------------------
    tk_pref = block_k if block_k is not None else 1024
    if hidden <= tk_pref:
        tk = hidden                                  # single full-width chunk
    else:
        tk = max(128, (min(tk_pref, hidden) // 128) * 128)

    def stream_bytes(tm, tk_):
        return (2 * tm * d_model * x_it              # x tile
                + 2 * d_model * tk_ * w_it           # W1 chunk (double-buffered)
                + 2 * tk_ * d_model * w_it           # W2 chunk (double-buffered)
                + 2 * tm * d_model * o_it            # out tile
                + tm * d_model * 4                   # f32 accumulator scratch
                + tm * tk_ * 4                       # h chunk (f32)
                + tm * tk_ * w_it)                   # h cast copy

    while True:
        for tm in tm_cands:
            if stream_bytes(tm, tk) <= budget:
                return ("stream", tm, tk)
        if tk > 128:
            tk = max(128, ((tk // 2) // 128) * 128)
        else:
            return ("stream", tm_cands[-1], tk)      # last resort


# ---------------------------------------------------------------------------
# Public entry point
# ---------------------------------------------------------------------------

@functools.partial(
    jax.jit,
    static_argnames=("block_m", "block_k", "vmem_limit_bytes", "force_stream"))
def positionwise_ffn(x, w1_t, b1, w2_t, b2, *, block_m=None, block_k=None,
                     vmem_limit_bytes=None, force_stream=False):
    """Fused FFN: relu(x @ W1^T + b1) @ W2^T + b2 (dropout = identity).

    x: (..., d_model).  w1_t: (d_model, hidden) (pre-transposed).
    w2_t: (hidden, d_model) (pre-transposed).  b1: (hidden,).  b2: (d_model,).
    Tile sizes / path are auto-planned from a VMEM budget unless overridden.
    """
    orig_shape = x.shape
    d_model = orig_shape[-1]
    hidden = w1_t.shape[1]

    x2d = x.reshape(-1, d_model)
    m = x2d.shape[0]

    x_it = x2d.dtype.itemsize
    w_it = w1_t.dtype.itemsize
    o_it = x_it

    budget = (int(vmem_limit_bytes) if vmem_limit_bytes is not None
              else _vmem_budget_bytes())

    plan = _plan(m, d_model, hidden, x_it, w_it, o_it, budget,
                 block_m, block_k, force_stream)

    b2_2d = b2.reshape(1, d_model)

    if plan[0] == "resident":
        # ------------------------------------------------------------------
        # Weights DMA'd once (constant block index), held in VMEM across all
        # row tiles.  Single "parallel" grid axis over row tiles.
        # ------------------------------------------------------------------
        tm = plan[1]
        m_pad = _round_up(m, tm)
        if m_pad != m:
            x2d = jnp.pad(x2d, ((0, m_pad - m), (0, 0)))
        b1_2d = b1.reshape(1, hidden)

        grid = (m_pad // tm,)
        cost = pl.CostEstimate(
            flops=int(4 * m_pad * d_model * hidden),
            transcendentals=0,
            bytes_accessed=int(
                m_pad * d_model * x_it                       # x
                + (w1_t.size + w2_t.size) * w_it             # weights, once
                + (b1.size + b2.size) * b1.dtype.itemsize    # biases
                + m_pad * d_model * o_it),                   # out
        )

        out2d = pl.pallas_call(
            _ffn_resident_kernel,
            out_shape=jax.ShapeDtypeStruct((m_pad, d_model), x.dtype),
            grid_spec=pltpu.PrefetchScalarGridSpec(
                num_scalar_prefetch=0,
                grid=grid,
                in_specs=[
                    pl.BlockSpec((tm, d_model), lambda i: (i, 0)),       # x rows
                    pl.BlockSpec((d_model, hidden), lambda i: (0, 0)),   # W1^T
                    pl.BlockSpec((1, hidden), lambda i: (0, 0)),         # b1
                    pl.BlockSpec((hidden, d_model), lambda i: (0, 0)),   # W2^T
                    pl.BlockSpec((1, d_model), lambda i: (0, 0)),        # b2
                ],
                out_specs=pl.BlockSpec((tm, d_model), lambda i: (i, 0)),
            ),
            compiler_params=pltpu.CompilerParams(
                dimension_semantics=("parallel",),
                vmem_limit_bytes=int(budget)),
            cost_estimate=cost,
        )(x2d, w1_t, b1_2d, w2_t, b2_2d)
    else:
        # ------------------------------------------------------------------
        # Streaming path: hidden tiled on a trailing "arbitrary" axis, f32
        # VMEM accumulator, weights re-streamed once per row tile.
        # ------------------------------------------------------------------
        tm, tk = plan[1], plan[2]
        m_pad = _round_up(m, tm)
        if m_pad != m:
            x2d = jnp.pad(x2d, ((0, m_pad - m), (0, 0)))

        # Zero-pad hidden to a tile multiple (padded W1 cols / b1 entries give
        # relu(0)=0 and padded W2 rows are zero => exact no-op on the result).
        hidden_pad = _round_up(hidden, tk)
        if hidden_pad != hidden:
            w1_t = jnp.pad(w1_t, ((0, 0), (0, hidden_pad - hidden)))
            b1 = jnp.pad(b1, ((0, hidden_pad - hidden),))
            w2_t = jnp.pad(w2_t, ((0, hidden_pad - hidden), (0, 0)))
        b1_2d = b1.reshape(1, hidden_pad)

        grid = (m_pad // tm, hidden_pad // tk)
        n_row_tiles = grid[0]
        cost = pl.CostEstimate(
            flops=int(4 * m_pad * d_model * hidden_pad),
            transcendentals=0,
            bytes_accessed=int(
                m_pad * d_model * x_it
                + n_row_tiles * (w1_t.size + w2_t.size) * w_it   # re-streamed
                + (b1_2d.size + b2_2d.size) * b1.dtype.itemsize
                + m_pad * d_model * o_it),
        )

        out2d = pl.pallas_call(
            _ffn_stream_kernel,
            out_shape=jax.ShapeDtypeStruct((m_pad, d_model), x.dtype),
            grid_spec=pltpu.PrefetchScalarGridSpec(
                num_scalar_prefetch=0,
                grid=grid,
                in_specs=[
                    pl.BlockSpec((tm, d_model), lambda i, k: (i, 0)),   # x rows
                    pl.BlockSpec((d_model, tk), lambda i, k: (0, k)),   # W1^T chunk
                    pl.BlockSpec((1, tk), lambda i, k: (0, k)),         # b1 chunk
                    pl.BlockSpec((tk, d_model), lambda i, k: (k, 0)),   # W2^T chunk
                    pl.BlockSpec((1, d_model), lambda i, k: (0, 0)),    # b2
                ],
                out_specs=pl.BlockSpec((tm, d_model), lambda i, k: (i, 0)),
                scratch_shapes=[pltpu.VMEM((tm, d_model), jnp.float32)],
            ),
            compiler_params=pltpu.CompilerParams(
                dimension_semantics=("parallel", "arbitrary"),
                vmem_limit_bytes=int(budget)),
            cost_estimate=cost,
        )(x2d, w1_t, b1_2d, w2_t, b2_2d)

    if m_pad != m:
        out2d = out2d[:m]
    return out2d.reshape(orig_shape)


# ---------------------------------------------------------------------------
# Reference / demo
# ---------------------------------------------------------------------------

def _init_linear(key, fan_in, fan_out, dtype=jnp.float32):
    """PyTorch nn.Linear default init: U(-1/sqrt(fan_in), 1/sqrt(fan_in))."""
    kw, kb = jax.random.split(key)
    bound = 1.0 / jnp.sqrt(fan_in)
    # Weight returned already transposed to (fan_in, fan_out) for the kernel.
    w_t = jax.random.uniform(kw, (fan_in, fan_out), dtype, -bound, bound)
    b = jax.random.uniform(kb, (fan_out,), dtype, -bound, bound)
    return w_t, b


def _ref_ffn(x, w1_t, b1, w2_t, b2):
    return jnp.maximum(x @ w1_t + b1, 0.0) @ w2_t + b2


if __name__ == "__main__":
    key = jax.random.PRNGKey(0)

    # --- Test 1: small shapes consistent with the module (resident fast path).
    batch, seq, d_model, hidden = 2, 8, 16, 32
    kx, k1, k2, key = jax.random.split(key, 4)
    x = jax.random.normal(kx, (batch, seq, d_model), jnp.float32)
    w1_t, b1 = _init_linear(k1, d_model, hidden)
    w2_t, b2 = _init_linear(k2, hidden, d_model)

    out = positionwise_ffn(x, w1_t, b1, w2_t, b2)
    out = jax.block_until_ready(out)
    ref = _ref_ffn(x, w1_t, b1, w2_t, b2)
    assert out.shape == x.shape
    assert jnp.allclose(out, ref, atol=1e-5, rtol=1e-5), "test1 mismatch"

    # --- Test 2: forced streaming path, exercises row padding + hidden-axis
    #             accumulation (grid (2, 2)).
    batch, seq, d_model, hidden = 2, 9, 128, 256
    kx, k1, k2, key = jax.random.split(key, 4)
    x = jax.random.normal(kx, (batch, seq, d_model), jnp.float32)
    w1_t, b1 = _init_linear(k1, d_model, hidden)
    w2_t, b2 = _init_linear(k2, hidden, d_model)

    out = positionwise_ffn(x, w1_t, b1, w2_t, b2,
                           block_m=16, block_k=128, force_stream=True)
    out = jax.block_until_ready(out)
    ref = _ref_ffn(x, w1_t, b1, w2_t, b2)
    assert out.shape == x.shape
    assert jnp.allclose(out, ref, atol=1e-3, rtol=1e-3), "test2 mismatch"

    # --- Test 3: bf16 activations/weights (recommended production dtype),
    #             resident fast path, f32 accumulation in-kernel.
    batch, seq, d_model, hidden = 2, 8, 128, 512
    kx, k1, k2, key = jax.random.split(key, 4)
    x = jax.random.normal(kx, (batch, seq, d_model), jnp.float32)
    w1_t, b1 = _init_linear(k1, d_model, hidden)
    w2_t, b2 = _init_linear(k2, hidden, d_model)
    xb = x.astype(jnp.bfloat16)
    w1b = w1_t.astype(jnp.bfloat16)
    w2b = w2_t.astype(jnp.bfloat16)

    out = positionwise_ffn(xb, w1b, b1, w2b, b2)
    out = jax.block_until_ready(out)
    ref = _ref_ffn(xb.astype(jnp.float32), w1b.astype(jnp.float32), b1,
                   w2b.astype(jnp.float32), b2)
    assert out.shape == xb.shape and out.dtype == jnp.bfloat16
    assert jnp.allclose(out.astype(jnp.float32), ref,
                        atol=5e-2, rtol=5e-2), "test3 mismatch"

    print("KERNEL_OK")
</pallas_src>

<mosaic_0001>
module attributes {stable_mosaic.version = 11 : i64} {
  func.func @_ffn_resident_kernel(%arg0: i32, %arg1: memref<16x16xf32, #tpu.memory_space<vmem>>, %arg2: memref<16x32xf32, #tpu.memory_space<vmem>>, %arg3: memref<1x32xf32, #tpu.memory_space<vmem>>, %arg4: memref<32x16xf32, #tpu.memory_space<vmem>>, %arg5: memref<1x16xf32, #tpu.memory_space<vmem>>, %arg6: memref<16x16xf32, #tpu.memory_space<vmem>>) attributes {dimension_semantics = [#tpu.dimension_semantics<parallel>], iteration_bounds = array<i64: 1>, scalar_prefetch = 0 : i64, scratch_operands = 0 : i64, tpu.core_type = #tpu.core_type<tc>, window_params = [{transform_indices = @transform_0, window_bounds = array<i64: 16, 16>}, {pipeline_mode = #tpu.pipeline_mode<synchronous>, transform_indices = @transform_1, window_bounds = array<i64: 16, 32>}, {pipeline_mode = #tpu.pipeline_mode<synchronous>, transform_indices = @transform_2, window_bounds = array<i64: 1, 32>}, {pipeline_mode = #tpu.pipeline_mode<synchronous>, transform_indices = @transform_3, window_bounds = array<i64: 32, 16>}, {pipeline_mode = #tpu.pipeline_mode<synchronous>, transform_indices = @transform_4, window_bounds = array<i64: 1, 16>}, {transform_indices = @transform_5, window_bounds = array<i64: 16, 16>}]} {
    %c0 = arith.constant 0 : index
    %c0_0 = arith.constant 0 : index
    %0 = vector.load %arg1[%c0, %c0_0] : memref<16x16xf32, #tpu.memory_space<vmem>>, vector<16x16xf32>
    %c0_1 = arith.constant 0 : index
    %c0_2 = arith.constant 0 : index
    %1 = vector.load %arg2[%c0_1, %c0_2] : memref<16x32xf32, #tpu.memory_space<vmem>>, vector<16x32xf32>
    %cst = arith.constant dense<0.000000e+00> : vector<16x32xf32>
    %2 = tpu.matmul %0, %1, %cst {dimension_numbers = #tpu.dot_dimension_numbers<[1], [0], [0], [1], [0, 0, 1, 1], [], []>} : vector<16x16xf32>, vector<16x32xf32>, vector<16x32xf32> -> vector<16x32xf32>
    %c0_3 = arith.constant 0 : index
    %c0_4 = arith.constant 0 : index
    %3 = vector.load %arg3[%c0_3, %c0_4] : memref<1x32xf32, #tpu.memory_space<vmem>>, vector<1x32xf32>
    %4 = vector.broadcast %3 : vector<1x32xf32> to vector<16x32xf32>
    %5 = arith.addf %2, %4 : vector<16x32xf32>
    %cst_5 = arith.constant 0.000000e+00 : f32
    %6 = vector.broadcast %cst_5 : f32 to vector<16x32xf32>
    %7 = arith.maximumf %5, %6 : vector<16x32xf32>
    %c0_6 = arith.constant 0 : index
    %c0_7 = arith.constant 0 : index
    %8 = vector.load %arg4[%c0_6, %c0_7] : memref<32x16xf32, #tpu.memory_space<vmem>>, vector<32x16xf32>
    %cst_8 = arith.constant dense<0.000000e+00> : vector<16x16xf32>
    %9 = tpu.matmul %7, %8, %cst_8 {dimension_numbers = #tpu.dot_dimension_numbers<[1], [0], [0], [1], [0, 0, 1, 1], [], []>} : vector<16x32xf32>, vector<32x16xf32>, vector<16x16xf32> -> vector<16x16xf32>
    %c0_9 = arith.constant 0 : index
    %c0_10 = arith.constant 0 : index
    %10 = vector.load %arg5[%c0_9, %c0_10] : memref<1x16xf32, #tpu.memory_space<vmem>>, vector<1x16xf32>
    %11 = vector.broadcast %10 : vector<1x16xf32> to vector<16x16xf32>
    %12 = arith.addf %9, %11 : vector<16x16xf32>
    %c0_11 = arith.constant 0 : index
    %c0_12 = arith.constant 0 : index
    %13 = vector.load %arg6[%c0_11, %c0_12] : memref<16x16xf32, #tpu.memory_space<vmem>>, vector<16x16xf32>
    tpu.vector_store %arg6[%c0_11, %c0_12], %12 {strides = array<i32>} : memref<16x16xf32, #tpu.memory_space<vmem>>, vector<16x16xf32>,
    return
  }
  func.func @transform_0(%arg0: i32) -> (i32, i32) {
    %c0_i32 = arith.constant 0 : i32
    %c0_i32_0 = arith.constant 0 : i32
    return %arg0, %c0_i32 : i32, i32
  }
  func.func @transform_1(%arg0: i32) -> (i32, i32) {
    %c0_i32 = arith.constant 0 : i32
    %c0_i32_0 = arith.constant 0 : i32
    %c0_i32_1 = arith.constant 0 : i32
    return %c0_i32, %c0_i32_0 : i32, i32
  }
  func.func @transform_2(%arg0: i32) -> (i32, i32) {
    %c0_i32 = arith.constant 0 : i32
    %c0_i32_0 = arith.constant 0 : i32
    %c0_i32_1 = arith.constant 0 : i32
    return %c0_i32, %c0_i32_0 : i32, i32
  }
  func.func @transform_3(%arg0: i32) -> (i32, i32) {
    %c0_i32 = arith.constant 0 : i32
    %c0_i32_0 = arith.constant 0 : i32
    %c0_i32_1 = arith.constant 0 : i32
    return %c0_i32, %c0_i32_0 : i32, i32
  }
  func.func @transform_4(%arg0: i32) -> (i32, i32) {
    %c0_i32 = arith.constant 0 : i32
    %c0_i32_0 = arith.constant 0 : i32
    %c0_i32_1 = arith.constant 0 : i32
    return %c0_i32, %c0_i32_0 : i32, i32
  }
  func.func @transform_5(%arg0: i32) -> (i32, i32) {
    %c0_i32 = arith.constant 0 : i32
    %c0_i32_0 = arith.constant 0 : i32
    return %arg0, %c0_i32 : i32, i32
  }
}

</mosaic_0001>

<bundles_post_ra>
// kernel: positionwise_ffn.1
= control target key start
LH: loop header
LB: loop body
LE: loop exit
PB: predicated region body
PF: predicated region fallthrough
CT: control target
= control target key end

     0   :  { %vm32_vm0 = vcmask 130048   ;;  %s356_s0 = inlined_call_operand.vmem [shape: f32[16,16], index: 0, kind: input, shape index: {}]   ;;  %s357_s1 = inlined_call_operand.vmem [shape: f32[16,32], index: 1, kind: input, shape index: {}]   ;;  %s358_s2 = inlined_call_operand.vmem [shape: f32[1,32], index: 2, kind: input, shape index: {}]   ;;  %s359_s3 = inlined_call_operand.vmem [shape: f32[32,16], index: 3, kind: input, shape index: {}]   ;;  %s360_s4 = inlined_call_operand.vmem [shape: f32[1,16], index: 4, kind: input, shape index: {}]   ;;  %s361_s5 = inlined_call_operand.hbm [shape: f32[16,16], index: 5, kind: output, shape index: {}]  }
   0x1   :  { %v24_v0 = vld [vmem:[%s357_s1 + $0x8] sm:$0xff]  ;;  %v23_v1 = vld [vmem:[%s357_s1] sm:$0xff] }
   0x2   :  { %v21_v2 = vld [vmem:[%s356_s0] sm:$0xff]  ;;  %243 = vmatprep.subr.mxu0 %v24_v0 }
   0x3   :  { %247 = vmatprep.mubr.msk.f32.mxu0 %vm32_vm0, %v21_v2 }
   0x4   :  { %10 = vsyncpa [#allocation3], 0  ;;  %244 = vmatpush3.msra.mxu0 %v24_v0  ;;  %v22_v3 = vld [vmem:[%s356_s0 + $0x8] sm:$0xff]  ;;  %v119_v4 = vld [vmem:[%s359_s3 + $0x18] sm:$0xff]  ;;  %vm127_vm1 = vcmask 261120  }
   0x5   :  { %245 = vmatprep.subr.mxu0 %v23_v1  ;;  %250 = vmatprep.subr.mxu1 %v119_v4  ;;  %v118_v5 = vld [vmem:[%s359_s3 + $0x10] sm:$0xff]  ;;  %v117_v6 = vld [vmem:[%s359_s3 + $0x8] sm:$0xff]  ;;  %v116_v7 = vld [vmem:[%s359_s3] sm:$0xff]  ;;  %s286_s3 = smov [#allocation2]  }
   0x6   :  { %246 = vmatpush3.msra.mxu0 %v23_v1  ;;  %251 = vmatpush3.msra.mxu1 %v119_v4  ;;  %v227_v8 = vld [vmem:[%s358_s2] ss:$0 sm:$0xff]  ;;  %s216_s11 = sshll.u32 %s286_s3, 4  ;;  %s217_s11 = int_to_ptr.vmem [resolvable:$true] %s216_s11 }
   0x7   :  { %248 = vmatmul.mubr.msk.f32.vlgmr.msra.gmra.mxu0 %vm32_vm0, %v22_v3  ;;  %252 = vmatprep.subr.mxu1 %v118_v5  ;;  %v230_v15 = vld [vmem:[%s360_s4] ss:$0 sm:$0xff]  ;;  %s264_s2 = scalar_lea.vmem %s217_s11, 256  ;;  %p269_p1 = scmp.lt.s32.totalorder %s217_s11, %s217_s11 }
   0x8   :  { %253 = vmatpush3.msra.mxu1 %v118_v5  ;;  %p265_p0 = scmp.ne.s32.totalorder %s217_s11, %s264_s2  ;;  %p270_p2 = scmp.lt.s32.totalorder %s264_s2, %s264_s2 }
   0x9   :  { %254 = vmatprep.subr.mxu1 %v117_v6 }
   0xa   :  { %255 = vmatpush3.msra.mxu1 %v117_v6  ;;  %p271_p3 = por %p270_p2, %p269_p1 }
   0xb   :  { %256 = vmatprep.subr.mxu1 %v116_v7 }
   0xc   :  { %257 = vmatpush3.msra.mxu1 %v116_v7  ;;  %p272_p4 = pnand %p271_p3, %p265_p0 }
  0xc7   :  { %v249_v9 = vpop.f32.mrf.mxu0 }
  0xc8   :  { %v111_v10 = vadd.f32 %v249_v9, %v227_v8 }
  0xc9   :  { %v105_v11 = vpop.f32.mrf.mxu0 }
  0xca   :  { %v106_v12 = vadd.f32 %v227_v8, %v105_v11  ;;  %v115_v14 = vmax.f32 %v111_v10, 0.0 }
  0xcc   :  { %v114_v13 = vmax.f32 %v106_v12, 0.0 }
  0xce   :  { %258 = vmatprep.mubr.msk.f32.mxu1 %vm127_vm1, %v114_v13 }
  0xcf   :  { %259 = vmatmul.mubr.msk.f32.vlgmr.msra.gmra.mxu1 %vm127_vm1, %v115_v14 }
 0x18f   :  { %v260_v16 = vpop.f32.mrf.mxu1 }
 0x190   :  { %v206_v17 = vadd.f32 %v260_v16, %v230_v15 }
 0x191   :  { %v200_v18 = vpop.f32.mrf.mxu1 }
 0x192   :  { %210 = vst.msk [vmem:[#allocation2 + $0x8] sm:$0xff] %vm32_vm0, %v206_v17  ;;  %v201_v19 = vadd.f32 %v230_v15, %v200_v18 }
 0x194   :  { %209 = vst.msk [vmem:[#allocation2] sm:$0xff] %vm32_vm0, %v201_v19 }
 0x195   :  { %275 = shalt.err (!%p272_p4)
}
 0x196   :  { %s287_s12 = smov 128   ;;  %s288_s4 = smov 8  }
 0x197   :  { %222 = dma.vmem_to_hbm [thread:$0]  %s217_s11, 256, %s361_s5, [#allocation3], %s287_s12, %s287_s12, %s288_s4  }
 0x198   :  { %284 = dma.done.wait [#allocation3], 256  }
 0x199   :  { %285 = vsyncadd [#allocation3], 4294967040 }
 0x19a   :  { %226 = vsyncpa [#allocation3], 1 }

</bundles_post_ra>
